<compile_context>
chip_gen: v7x
topology: tpu7x:2x2x1
jax: 0.10.0
libtpu: 0.0.40
codegen_flags: <defaults>
</compile_context>

<pallas_src>
import jax
import jax.numpy as jnp
from jax import lax
from jax.experimental import pallas as pl
from jax.experimental.pallas import tpu as pltpu


# ----------------------------------------------------------------------------
# kernel
# ----------------------------------------------------------------------------
def _make_attention_kernel(tq, has_rel):
    def kernel(*refs):
        if has_rel:
            (xkv_ref, rel_ref, wq_ref, wk_ref, wv_ref, wp_ref, bp_ref,
             out_ref, relation_ref, kc_ref, vc_ref, acc_ref) = refs
        else:
            (xkv_ref, wq_ref, wk_ref, wv_ref, wp_ref, bp_ref,
             out_ref, relation_ref, kc_ref, vc_ref, acc_ref) = refs
            rel_ref = None

        # xkv_ref:  (1, N, C)  bf16   full sequence (resident per batch)
        # rel_ref:  (1, 1, TQ, N)     relations tile (only when has_rel)
        # wq/wk/wv: (H, C, hd) bf16   per-head weight slabs (resident; wq
        #                             already has the softmax scale folded in)
        # wp_ref:   (H, hd, C) bf16   per-head proj weight slabs (resident)
        # bp_ref:   (1, C) f32
        # out_ref:  (1, TQ, C);  relation_ref: (1, 1, TQ, N)
        # kc/vc:    (H, N, hd) bf16 scratch — per-batch K/V cache
        # acc_ref:  (TQ, C) f32 scratch — per-head output-proj accumulator
        qi = pl.program_id(1)
        h = pl.program_id(2)

        @pl.when(h == 0)
        def _():
            acc_ref[...] = jnp.zeros_like(acc_ref)

        # Project K/V for this (batch, head) exactly once (first q-block),
        # cache in VMEM and reuse for every other q-block of this batch.
        @pl.when(qi == 0)
        def _():
            xkv = xkv_ref[0]                                     # (N, C) bf16
            kc_ref[h] = jnp.dot(xkv, wk_ref[h],
                                preferred_element_type=jnp.float32
                                ).astype(kc_ref.dtype)
            vc_ref[h] = jnp.dot(xkv, wv_ref[h],
                                preferred_element_type=jnp.float32
                                ).astype(vc_ref.dtype)

        # Query rows for this q-block, sliced from the resident xkv block
        # (no duplicate xq input / HBM read).
        row0 = pl.multiple_of(qi * tq, tq)
        xq = xkv_ref[0, pl.ds(row0, tq), :]                      # (tq, C) bf16

        # Q projection (scale pre-folded into wq), fp32 accumulation.
        q = jnp.dot(xq, wq_ref[h], preferred_element_type=jnp.float32)

        # Scores for this (head, q-block): (tq, N) — bf16 MXU inputs, f32 acc.
        s = lax.dot_general(
            q.astype(jnp.bfloat16), kc_ref[h],
            dimension_numbers=(((1,), (1,)), ((), ())),
            preferred_element_type=jnp.float32)
        if has_rel:
            s = s + rel_ref[0, 0].astype(jnp.float32)

        # Pre-softmax scores are the "relation" output (streamed per tile).
        relation_ref[0, 0] = s.astype(relation_ref.dtype)

        # Numerically-stable softmax over keys (EUP reciprocal for the denom).
        m = jnp.max(s, axis=-1, keepdims=True)
        p = jnp.exp(s - m)
        denom = jnp.sum(p, axis=-1, keepdims=True)
        p = p * pl.reciprocal(denom, approx=True)
        # attn_drop is identity (p = 0.0)

        # Weighted sum of values: (tq, hd).
        out_h = jnp.dot(p.astype(jnp.bfloat16), vc_ref[h],
                        preferred_element_type=jnp.float32)

        # Accumulate this head's contribution to the output projection:
        # (tq, hd) @ (hd, C) — avoids the (N, H, hd) -> (N, C) merge reshape.
        acc_ref[...] += jnp.dot(out_h.astype(jnp.bfloat16), wp_ref[h],
                                preferred_element_type=jnp.float32)

        @pl.when(h == pl.num_programs(2) - 1)
        def _():
            # proj_drop is identity (p = 0.0)
            out_ref[0] = (acc_ref[...] + bp_ref[...]).astype(out_ref.dtype)

    return kernel


# ----------------------------------------------------------------------------
# wrapper
# ----------------------------------------------------------------------------
def _vmem_capacity_bytes():
    try:
        info = pltpu.get_tpu_info()
        cap = getattr(info, "vmem_capacity_bytes", None)
        if cap:
            return int(cap)
    except Exception:
        pass
    return 64 * 1024 * 1024          # conservative default (v7x-sized)


def _pick_tq(N, tq_max):
    """Largest divisor of N that is a multiple of 8 and <= tq_max (or N)."""
    if N <= tq_max:
        return N
    for t in range(tq_max, 7, -1):
        if N % t == 0 and t % 8 == 0:
            return t
    return N                         # full-dim fallback (toy / odd shapes)


def attention_forward(x, relations_to_be_reused, w_qkv_t, w_proj_t, b_proj,
                      num_heads, *, tq=None, relation_dtype=None):
    """x: (B, N, C); relations_to_be_reused: (B, H, N, N) or None.

    w_qkv_t: (C, 3C) = qkv.weight.T, w_proj_t: (C, C) = proj.weight.T,
    b_proj: (C,).  Returns (x_out (B, N, C), relation (B, H, N, N)).
    relation_dtype: pass jnp.bfloat16 to halve relation HBM traffic if
    downstream tolerates bf16; defaults to fp32 / the rel input dtype."""
    B, N, C = x.shape
    head_dim = C // num_heads
    scale = head_dim ** (-0.5)
    has_rel = relations_to_be_reused is not None

    # ---- generation-dependent knobs (v7x has 64 MiB VMEM, v5e/v6e 128 MiB)
    vmem_cap = _vmem_capacity_bytes()
    vmem_limit = min((vmem_cap * 3) // 4, 100 * 1024 * 1024)
    if tq is None:
        tq_max = 128 if vmem_cap <= 80 * 1024 * 1024 else 256
        tq = _pick_tq(N, tq_max)
    assert N % tq == 0, "tq must divide N"

    # ---- rearrange parameters to per-head bf16 slabs (host side, once).
    # qkv output column layout is [i*C + h*hd + d]  (i in {q,k,v}).
    wqkv = w_qkv_t.reshape(C, 3, num_heads, head_dim).transpose(1, 2, 0, 3)
    wq = (wqkv[0] * scale).astype(jnp.bfloat16)              # scale folded in
    wk = wqkv[1].astype(jnp.bfloat16)                        # (H, C, hd)
    wv = wqkv[2].astype(jnp.bfloat16)                        # (H, C, hd)
    wproj_h = w_proj_t.reshape(num_heads, head_dim, C).astype(jnp.bfloat16)
    bproj2d = b_proj.reshape(1, C).astype(jnp.float32)
    x_bf16 = x.astype(jnp.bfloat16)

    if relation_dtype is None:
        relation_dtype = (relations_to_be_reused.dtype if has_rel
                          else jnp.float32)

    out_shapes = (
        jax.ShapeDtypeStruct((B, N, C), x.dtype),
        jax.ShapeDtypeStruct((B, num_heads, N, N), relation_dtype),
    )

    # ---- BlockSpecs
    in_specs = [
        # full sequence for Q-slices and the (once-per-batch) K/V projection;
        # constant index over (qi, h) -> fetched once per batch.
        pl.BlockSpec((1, N, C), lambda b, qi, h: (b, 0, 0)),
    ]
    inputs = [x_bf16]
    if has_rel:
        in_specs.append(
            pl.BlockSpec((1, 1, tq, N), lambda b, qi, h: (b, h, qi, 0)))
        inputs.append(relations_to_be_reused)
    in_specs += [
        # weights: constant index maps -> stay resident in VMEM
        pl.BlockSpec((num_heads, C, head_dim), lambda b, qi, h: (0, 0, 0)),
        pl.BlockSpec((num_heads, C, head_dim), lambda b, qi, h: (0, 0, 0)),
        pl.BlockSpec((num_heads, C, head_dim), lambda b, qi, h: (0, 0, 0)),
        pl.BlockSpec((num_heads, head_dim, C), lambda b, qi, h: (0, 0, 0)),
        pl.BlockSpec((1, C), lambda b, qi, h: (0, 0)),
    ]
    inputs += [wq, wk, wv, wproj_h, bproj2d]

    grid_spec = pltpu.PrefetchScalarGridSpec(
        num_scalar_prefetch=0,
        grid=(B, N // tq, num_heads),
        in_specs=in_specs,
        out_specs=[
            # same block across h -> resident target, written on last head
            pl.BlockSpec((1, tq, C), lambda b, qi, h: (b, qi, 0)),
            # relation streams out tile-by-tile
            pl.BlockSpec((1, 1, tq, N), lambda b, qi, h: (b, h, qi, 0)),
        ],
        scratch_shapes=[
            pltpu.VMEM((num_heads, N, head_dim), jnp.bfloat16),   # K cache
            pltpu.VMEM((num_heads, N, head_dim), jnp.bfloat16),   # V cache
            pltpu.VMEM((tq, C), jnp.float32),                     # proj acc
        ],
    )

    kernel = _make_attention_kernel(tq, has_rel)

    return pl.pallas_call(
        kernel,
        out_shape=out_shapes,
        grid_spec=grid_spec,
        compiler_params=pltpu.CompilerParams(
            # Batch axis is parallel (megacore-shardable on v7x).  The
            # q-block axis must be "arbitrary": the K/V VMEM cache filled at
            # qi == 0 is reused by later q-blocks of the same batch.  The
            # head axis is the output-projection reduction.
            dimension_semantics=("parallel", "arbitrary", "arbitrary"),
            vmem_limit_bytes=int(vmem_limit),
        ),
    )(*inputs)


# ----------------------------------------------------------------------------
# pure-JAX reference
# ----------------------------------------------------------------------------
def attention_reference(x, rel, w_qkv_t, w_proj_t, b_proj, num_heads):
    B, N, C = x.shape
    hd = C // num_heads
    scale = hd ** (-0.5)
    qkv = (x @ w_qkv_t).reshape(B, N, 3, num_heads, hd).transpose(2, 0, 3, 1, 4)
    q, k, v = qkv[0], qkv[1], qkv[2]
    attn = jnp.einsum('bhqd,bhkd->bhqk', q, k) * scale
    if rel is not None:
        attn = attn + rel
    relation = attn
    attn = jax.nn.softmax(attn, axis=-1)
    out = jnp.einsum('bhqk,bhkd->bhqd', attn, v).transpose(0, 2, 1, 3).reshape(B, N, C)
    out = out @ w_proj_t + b_proj
    return out, relation


if __name__ == "__main__":
    # small shapes consistent with the module
    B, N, C = 2, 8, 32
    num_heads = 4          # head_dim = 8

    key = jax.random.PRNGKey(0)
    k_x, k_rel, k_wqkv, k_wproj, k_bproj = jax.random.split(key, 5)

    x = jax.random.normal(k_x, (B, N, C), dtype=jnp.float32)
    relations = 0.1 * jax.random.normal(k_rel, (B, num_heads, N, N),
                                        dtype=jnp.float32)

    # nn.Linear weights are (out, in); the wrapper takes W^T = (in, out).
    w_qkv = 0.05 * jax.random.normal(k_wqkv, (3 * C, C), dtype=jnp.float32)
    w_proj = 0.05 * jax.random.normal(k_wproj, (C, C), dtype=jnp.float32)
    b_proj = 0.05 * jax.random.normal(k_bproj, (C,), dtype=jnp.float32)
    w_qkv_t = w_qkv.T          # (C, 3C)
    w_proj_t = w_proj.T        # (C, C)

    # --- with relations ------------------------------------------------------
    out, relation = attention_forward(x, relations, w_qkv_t, w_proj_t, b_proj,
                                      num_heads)
    jax.block_until_ready((out, relation))
    ref_out, ref_rel = attention_reference(x, relations, w_qkv_t, w_proj_t,
                                           b_proj, num_heads)
    assert jnp.allclose(out, ref_out, atol=2e-2, rtol=2e-2), "output mismatch"
    assert jnp.allclose(relation, ref_rel, atol=2e-2, rtol=2e-2), \
        "relation mismatch"

    # --- no-relations fast path (relations_to_be_reused is None) -------------
    out0, relation0 = attention_forward(x, None, w_qkv_t, w_proj_t, b_proj,
                                        num_heads)
    jax.block_until_ready((out0, relation0))
    ref_out0, ref_rel0 = attention_reference(x, None, w_qkv_t, w_proj_t,
                                             b_proj, num_heads)
    assert jnp.allclose(out0, ref_out0, atol=2e-2, rtol=2e-2), \
        "output mismatch (no-rel path)"
    assert jnp.allclose(relation0, ref_rel0, atol=2e-2, rtol=2e-2), \
        "relation mismatch (no-rel path)"

    print("KERNEL_OK")
</pallas_src>

<mosaic_0001>
module attributes {stable_mosaic.version = 11 : i64} {
  func.func @kernel(%arg0: i32, %arg1: i32, %arg2: i32, %arg3: memref<1x8x32xbf16, #tpu.memory_space<vmem>>, %arg4: memref<1x1x8x8xf32, #tpu.memory_space<vmem>>, %arg5: memref<4x32x8xbf16, #tpu.memory_space<vmem>>, %arg6: memref<4x32x8xbf16, #tpu.memory_space<vmem>>, %arg7: memref<4x32x8xbf16, #tpu.memory_space<vmem>>, %arg8: memref<4x8x32xbf16, #tpu.memory_space<vmem>>, %arg9: memref<1x32xf32, #tpu.memory_space<vmem>>, %arg10: memref<1x8x32xf32, #tpu.memory_space<vmem>>, %arg11: memref<1x1x8x8xf32, #tpu.memory_space<vmem>>, %arg12: memref<4x8x8xbf16, #tpu.memory_space<vmem>>, %arg13: memref<4x8x8xbf16, #tpu.memory_space<vmem>>, %arg14: memref<8x32xf32, #tpu.memory_space<vmem>>) attributes {dimension_semantics = [#tpu.dimension_semantics<parallel>, #tpu.dimension_semantics<arbitrary>, #tpu.dimension_semantics<arbitrary>], iteration_bounds = array<i64: 2, 1, 4>, scalar_prefetch = 0 : i64, scratch_operands = 3 : i64, tpu.core_type = #tpu.core_type<tc>, window_params = [{transform_indices = @transform_0, window_bounds = array<i64: 1, 8, 32>}, {transform_indices = @transform_1, window_bounds = array<i64: 1, 1, 8, 8>}, {pipeline_mode = #tpu.pipeline_mode<synchronous>, transform_indices = @transform_2, window_bounds = array<i64: 4, 32, 8>}, {pipeline_mode = #tpu.pipeline_mode<synchronous>, transform_indices = @transform_3, window_bounds = array<i64: 4, 32, 8>}, {pipeline_mode = #tpu.pipeline_mode<synchronous>, transform_indices = @transform_4, window_bounds = array<i64: 4, 32, 8>}, {pipeline_mode = #tpu.pipeline_mode<synchronous>, transform_indices = @transform_5, window_bounds = array<i64: 4, 8, 32>}, {pipeline_mode = #tpu.pipeline_mode<synchronous>, transform_indices = @transform_6, window_bounds = array<i64: 1, 32>}, {transform_indices = @transform_7, window_bounds = array<i64: 1, 8, 32>}, {transform_indices = @transform_8, window_bounds = array<i64: 1, 1, 8, 8>}]} {
    %c0_i32 = arith.constant 0 : i32
    %0 = arith.cmpi eq, %arg2, %c0_i32 : i32
    %1 = arith.extui %0 : i1 to i32
    %c0_i32_0 = arith.constant 0 : i32
    %2 = arith.cmpi ne, %1, %c0_i32_0 : i32
    scf.if %2 {
      %cst_30 = arith.constant 0.000000e+00 : f32
      %52 = vector.broadcast %cst_30 : f32 to vector<8x32xf32>
      %c0_31 = arith.constant 0 : index
      %c0_32 = arith.constant 0 : index
      %53 = vector.load %arg14[%c0_31, %c0_32] : memref<8x32xf32, #tpu.memory_space<vmem>>, vector<8x32xf32>
      tpu.vector_store %arg14[%c0_31, %c0_32], %52 {strides = array<i32>} : memref<8x32xf32, #tpu.memory_space<vmem>>, vector<8x32xf32>,
    } else {
    }
    %c0_i32_1 = arith.constant 0 : i32
    %3 = arith.cmpi eq, %arg1, %c0_i32_1 : i32
    %4 = arith.extui %3 : i1 to i32
    %c0_i32_2 = arith.constant 0 : i32
    %5 = arith.cmpi ne, %4, %c0_i32_2 : i32
    scf.if %5 {
      %c0_30 = arith.constant 0 : index
      %c0_31 = arith.constant 0 : index
      %c0_32 = arith.constant 0 : index
      %52 = vector.load %arg3[%c0_30, %c0_31, %c0_32] : memref<1x8x32xbf16, #tpu.memory_space<vmem>>, vector<1x8x32xbf16>
      %53 = vector.shape_cast %52 : vector<1x8x32xbf16> to vector<8x32xbf16>
      %54 = arith.index_cast %arg2 : i32 to index
      %c0_33 = arith.constant 0 : index
      %c0_34 = arith.constant 0 : index
      %55 = vector.load %arg6[%54, %c0_33, %c0_34] : memref<4x32x8xbf16, #tpu.memory_space<vmem>>, vector<1x32x8xbf16>
      %56 = vector.shape_cast %55 : vector<1x32x8xbf16> to vector<32x8xbf16>
      %cst_35 = arith.constant dense<0.000000e+00> : vector<8x8xf32>
      %57 = tpu.matmul %53, %56, %cst_35 {dimension_numbers = #tpu.dot_dimension_numbers<[1], [0], [0], [1], [0, 0, 1, 1], [], []>} : vector<8x32xbf16>, vector<32x8xbf16>, vector<8x8xf32> -> vector<8x8xf32>
      %58 = arith.truncf %57 : vector<8x8xf32> to vector<8x8xbf16>
      %59 = arith.index_cast %arg2 : i32 to index
      %c0_36 = arith.constant 0 : index
      %c0_37 = arith.constant 0 : index
      %60 = vector.load %arg12[%59, %c0_36, %c0_37] : memref<4x8x8xbf16, #tpu.memory_space<vmem>>, vector<1x8x8xbf16>
      %61 = vector.shape_cast %60 : vector<1x8x8xbf16> to vector<8x8xbf16>
      %62 = vector.shape_cast %58 : vector<8x8xbf16> to vector<1x8x8xbf16>
      tpu.vector_store %arg12[%59, %c0_36, %c0_37], %62 {strides = array<i32>} : memref<4x8x8xbf16, #tpu.memory_space<vmem>>, vector<1x8x8xbf16>,
      %63 = arith.index_cast %arg2 : i32 to index
      %c0_38 = arith.constant 0 : index
      %c0_39 = arith.constant 0 : index
      %64 = vector.load %arg7[%63, %c0_38, %c0_39] : memref<4x32x8xbf16, #tpu.memory_space<vmem>>, vector<1x32x8xbf16>
      %65 = vector.shape_cast %64 : vector<1x32x8xbf16> to vector<32x8xbf16>
      %cst_40 = arith.constant dense<0.000000e+00> : vector<8x8xf32>
      %66 = tpu.matmul %53, %65, %cst_40 {dimension_numbers = #tpu.dot_dimension_numbers<[1], [0], [0], [1], [0, 0, 1, 1], [], []>} : vector<8x32xbf16>, vector<32x8xbf16>, vector<8x8xf32> -> vector<8x8xf32>
      %67 = arith.truncf %66 : vector<8x8xf32> to vector<8x8xbf16>
      %68 = arith.index_cast %arg2 : i32 to index
      %c0_41 = arith.constant 0 : index
      %c0_42 = arith.constant 0 : index
      %69 = vector.load %arg13[%68, %c0_41, %c0_42] : memref<4x8x8xbf16, #tpu.memory_space<vmem>>, vector<1x8x8xbf16>
      %70 = vector.shape_cast %69 : vector<1x8x8xbf16> to vector<8x8xbf16>
      %71 = vector.shape_cast %67 : vector<8x8xbf16> to vector<1x8x8xbf16>
      tpu.vector_store %arg13[%68, %c0_41, %c0_42], %71 {strides = array<i32>} : memref<4x8x8xbf16, #tpu.memory_space<vmem>>, vector<1x8x8xbf16>,
    } else {
    }
    %c8_i32 = arith.constant 8 : i32
    %6 = arith.muli %arg1, %c8_i32 : i32
    %7 = tpu.assume_multiple %6, 8 : i32
    %c0 = arith.constant 0 : index
    %8 = arith.index_cast %7 : i32 to index
    %c0_3 = arith.constant 0 : index
    %9 = vector.load %arg3[%c0, %8, %c0_3] : memref<1x8x32xbf16, #tpu.memory_space<vmem>>, vector<1x8x32xbf16>
    %10 = vector.shape_cast %9 : vector<1x8x32xbf16> to vector<8x32xbf16>
    %11 = arith.index_cast %arg2 : i32 to index
    %c0_4 = arith.constant 0 : index
    %c0_5 = arith.constant 0 : index
    %12 = vector.load %arg5[%11, %c0_4, %c0_5] : memref<4x32x8xbf16, #tpu.memory_space<vmem>>, vector<1x32x8xbf16>
    %13 = vector.shape_cast %12 : vector<1x32x8xbf16> to vector<32x8xbf16>
    %cst = arith.constant dense<0.000000e+00> : vector<8x8xf32>
    %14 = tpu.matmul %10, %13, %cst {dimension_numbers = #tpu.dot_dimension_numbers<[1], [0], [0], [1], [0, 0, 1, 1], [], []>} : vector<8x32xbf16>, vector<32x8xbf16>, vector<8x8xf32> -> vector<8x8xf32>
    %15 = arith.truncf %14 : vector<8x8xf32> to vector<8x8xbf16>
    %16 = arith.index_cast %arg2 : i32 to index
    %c0_6 = arith.constant 0 : index
    %c0_7 = arith.constant 0 : index
    %17 = vector.load %arg12[%16, %c0_6, %c0_7] : memref<4x8x8xbf16, #tpu.memory_space<vmem>>, vector<1x8x8xbf16>
    %18 = vector.shape_cast %17 : vector<1x8x8xbf16> to vector<8x8xbf16>
    %cst_8 = arith.constant dense<0.000000e+00> : vector<8x8xf32>
    %19 = tpu.matmul %15, %18, %cst_8 {dimension_numbers = #tpu.dot_dimension_numbers<[1], [1], [0], [0], [0, 0, 1, 0], [], []>} : vector<8x8xbf16>, vector<8x8xbf16>, vector<8x8xf32> -> vector<8x8xf32>
    %c0_9 = arith.constant 0 : index
    %c0_10 = arith.constant 0 : index
    %c0_11 = arith.constant 0 : index
    %c0_12 = arith.constant 0 : index
    %20 = vector.load %arg4[%c0_9, %c0_10, %c0_11, %c0_12] : memref<1x1x8x8xf32, #tpu.memory_space<vmem>>, vector<1x1x8x8xf32>
    %21 = vector.shape_cast %20 : vector<1x1x8x8xf32> to vector<8x8xf32>
    %22 = arith.addf %19, %21 : vector<8x8xf32>
    %c0_13 = arith.constant 0 : index
    %c0_14 = arith.constant 0 : index
    %c0_15 = arith.constant 0 : index
    %c0_16 = arith.constant 0 : index
    %23 = vector.load %arg11[%c0_13, %c0_14, %c0_15, %c0_16] : memref<1x1x8x8xf32, #tpu.memory_space<vmem>>, vector<1x1x8x8xf32>
    %24 = vector.shape_cast %23 : vector<1x1x8x8xf32> to vector<8x8xf32>
    %25 = vector.shape_cast %22 : vector<8x8xf32> to vector<1x1x8x8xf32>
    tpu.vector_store %arg11[%c0_13, %c0_14, %c0_15, %c0_16], %25 {strides = array<i32>} : memref<1x1x8x8xf32, #tpu.memory_space<vmem>>, vector<1x1x8x8xf32>,
    %cst_17 = arith.constant dense<0xFF800000> : vector<8xf32>
    %26 = vector.multi_reduction <maximumf>, %22, %cst_17 [1] : vector<8x8xf32> to vector<8xf32>
    %27 = vector.shape_cast %26 : vector<8xf32> to vector<8x1xf32>
    %28 = vector.broadcast %27 : vector<8x1xf32> to vector<8x8xf32>
    %29 = arith.subf %22, %28 : vector<8x8xf32>
    %30 = math.exp %29 : vector<8x8xf32>
    %cst_18 = arith.constant dense<0.000000e+00> : vector<8xf32>
    %31 = vector.multi_reduction <add>, %30, %cst_18 [1] : vector<8x8xf32> to vector<8xf32>
    %32 = vector.shape_cast %31 : vector<8xf32> to vector<8x1xf32>
    %33 = tpu.reciprocal %32 {approx = true} : vector<8x1xf32> -> vector<8x1xf32>
    %34 = vector.broadcast %33 : vector<8x1xf32> to vector<8x8xf32>
    %35 = arith.mulf %30, %34 : vector<8x8xf32>
    %36 = arith.truncf %35 : vector<8x8xf32> to vector<8x8xbf16>
    %37 = arith.index_cast %arg2 : i32 to index
    %c0_19 = arith.constant 0 : index
    %c0_20 = arith.constant 0 : index
    %38 = vector.load %arg13[%37, %c0_19, %c0_20] : memref<4x8x8xbf16, #tpu.memory_space<vmem>>, vector<1x8x8xbf16>
    %39 = vector.shape_cast %38 : vector<1x8x8xbf16> to vector<8x8xbf16>
    %cst_21 = arith.constant dense<0.000000e+00> : vector<8x8xf32>
    %40 = tpu.matmul %36, %39, %cst_21 {dimension_numbers = #tpu.dot_dimension_numbers<[1], [0], [0], [1], [0, 0, 1, 1], [], []>} : vector<8x8xbf16>, vector<8x8xbf16>, vector<8x8xf32> -> vector<8x8xf32>
    %c0_22 = arith.constant 0 : index
    %c0_23 = arith.constant 0 : index
    %41 = vector.load %arg14[%c0_22, %c0_23] : memref<8x32xf32, #tpu.memory_space<vmem>>, vector<8x32xf32>
    %42 = arith.truncf %40 : vector<8x8xf32> to vector<8x8xbf16>
    %43 = arith.index_cast %arg2 : i32 to index
    %c0_24 = arith.constant 0 : index
    %c0_25 = arith.constant 0 : index
    %44 = vector.load %arg8[%43, %c0_24, %c0_25] : memref<4x8x32xbf16, #tpu.memory_space<vmem>>, vector<1x8x32xbf16>
    %45 = vector.shape_cast %44 : vector<1x8x32xbf16> to vector<8x32xbf16>
    %cst_26 = arith.constant dense<0.000000e+00> : vector<8x32xf32>
    %46 = tpu.matmul %42, %45, %cst_26 {dimension_numbers = #tpu.dot_dimension_numbers<[1], [0], [0], [1], [0, 0, 1, 1], [], []>} : vector<8x8xbf16>, vector<8x32xbf16>, vector<8x32xf32> -> vector<8x32xf32>
    %47 = arith.addf %41, %46 : vector<8x32xf32>
    %c0_27 = arith.constant 0 : index
    %c0_28 = arith.constant 0 : index
    %48 = vector.load %arg14[%c0_27, %c0_28] : memref<8x32xf32, #tpu.memory_space<vmem>>, vector<8x32xf32>
    tpu.vector_store %arg14[%c0_27, %c0_28], %47 {strides = array<i32>} : memref<8x32xf32, #tpu.memory_space<vmem>>, vector<8x32xf32>,
    %c3_i32 = arith.constant 3 : i32
    %49 = arith.cmpi eq, %arg2, %c3_i32 : i32
    %50 = arith.extui %49 : i1 to i32
    %c0_i32_29 = arith.constant 0 : i32
    %51 = arith.cmpi ne, %50, %c0_i32_29 : i32
    scf.if %51 {
      %c0_30 = arith.constant 0 : index
      %c0_31 = arith.constant 0 : index
      %52 = vector.load %arg14[%c0_30, %c0_31] : memref<8x32xf32, #tpu.memory_space<vmem>>, vector<8x32xf32>
      %c0_32 = arith.constant 0 : index
      %c0_33 = arith.constant 0 : index
      %53 = vector.load %arg9[%c0_32, %c0_33] : memref<1x32xf32, #tpu.memory_space<vmem>>, vector<1x32xf32>
      %54 = vector.broadcast %53 : vector<1x32xf32> to vector<8x32xf32>
      %55 = arith.addf %52, %54 : vector<8x32xf32>
      %c0_34 = arith.constant 0 : index
      %c0_35 = arith.constant 0 : index
      %c0_36 = arith.constant 0 : index
      %56 = vector.load %arg10[%c0_34, %c0_35, %c0_36] : memref<1x8x32xf32, #tpu.memory_space<vmem>>, vector<1x8x32xf32>
      %57 = vector.shape_cast %56 : vector<1x8x32xf32> to vector<8x32xf32>
      %58 = vector.shape_cast %55 : vector<8x32xf32> to vector<1x8x32xf32>
      tpu.vector_store %arg10[%c0_34, %c0_35, %c0_36], %58 {strides = array<i32>} : memref<1x8x32xf32, #tpu.memory_space<vmem>>, vector<1x8x32xf32>,
    } else {
    }
    return
  }
  func.func @transform_0(%arg0: i32, %arg1: i32, %arg2: i32) -> (i32, i32, i32) {
    %c0_i32 = arith.constant 0 : i32
    %c0_i32_0 = arith.constant 0 : i32
    %c0_i32_1 = arith.constant 0 : i32
    return %arg0, %c0_i32, %c0_i32_0 : i32, i32, i32
  }
  func.func @transform_1(%arg0: i32, %arg1: i32, %arg2: i32) -> (i32, i32, i32, i32) {
    %c0_i32 = arith.constant 0 : i32
    %c0_i32_0 = arith.constant 0 : i32
    return %arg0, %arg2, %arg1, %c0_i32 : i32, i32, i32, i32
  }
  func.func @transform_2(%arg0: i32, %arg1: i32, %arg2: i32) -> (i32, i32, i32) {
    %c0_i32 = arith.constant 0 : i32
    %c0_i32_0 = arith.constant 0 : i32
    %c0_i32_1 = arith.constant 0 : i32
    %c0_i32_2 = arith.constant 0 : i32
    return %c0_i32, %c0_i32_0, %c0_i32_1 : i32, i32, i32
  }
  func.func @transform_3(%arg0: i32, %arg1: i32, %arg2: i32) -> (i32, i32, i32) {
    %c0_i32 = arith.constant 0 : i32
    %c0_i32_0 = arith.constant 0 : i32
    %c0_i32_1 = arith.constant 0 : i32
    %c0_i32_2 = arith.constant 0 : i32
    return %c0_i32, %c0_i32_0, %c0_i32_1 : i32, i32, i32
  }
  func.func @transform_4(%arg0: i32, %arg1: i32, %arg2: i32) -> (i32, i32, i32) {
    %c0_i32 = arith.constant 0 : i32
    %c0_i32_0 = arith.constant 0 : i32
    %c0_i32_1 = arith.constant 0 : i32
    %c0_i32_2 = arith.constant 0 : i32
    return %c0_i32, %c0_i32_0, %c0_i32_1 : i32, i32, i32
  }
  func.func @transform_5(%arg0: i32, %arg1: i32, %arg2: i32) -> (i32, i32, i32) {
    %c0_i32 = arith.constant 0 : i32
    %c0_i32_0 = arith.constant 0 : i32
    %c0_i32_1 = arith.constant 0 : i32
    %c0_i32_2 = arith.constant 0 : i32
    return %c0_i32, %c0_i32_0, %c0_i32_1 : i32, i32, i32
  }
  func.func @transform_6(%arg0: i32, %arg1: i32, %arg2: i32) -> (i32, i32) {
    %c0_i32 = arith.constant 0 : i32
    %c0_i32_0 = arith.constant 0 : i32
    %c0_i32_1 = arith.constant 0 : i32
    return %c0_i32, %c0_i32_0 : i32, i32
  }
  func.func @transform_7(%arg0: i32, %arg1: i32, %arg2: i32) -> (i32, i32, i32) {
    %c0_i32 = arith.constant 0 : i32
    %c0_i32_0 = arith.constant 0 : i32
    return %arg0, %arg1, %c0_i32 : i32, i32, i32
  }
  func.func @transform_8(%arg0: i32, %arg1: i32, %arg2: i32) -> (i32, i32, i32, i32) {
    %c0_i32 = arith.constant 0 : i32
    %c0_i32_0 = arith.constant 0 : i32
    return %arg0, %arg2, %arg1, %c0_i32 : i32, i32, i32, i32
  }
}

</mosaic_0001>

<bundles_post_ra>
// kernel: tpu_custom_call.1
= control target key start
LH: loop header
LB: loop body
LE: loop exit
PB: predicated region body
PF: predicated region fallthrough
CT: control target
= control target key end

     0   :  { %s1664_s0 = inlined_call_operand.vmem [shape: bf16[2,8,32], index: 0, kind: input, shape index: {}]   ;;  %s1665_s1 = inlined_call_operand.vmem [shape: f32[2,4,8,8], index: 1, kind: input, shape index: {}]   ;;  %s1666_s2 = inlined_call_operand.vmem [shape: bf16[4,32,8], index: 2, kind: input, shape index: {}]   ;;  %s1667_s3 = inlined_call_operand.vmem [shape: bf16[4,32,8], index: 3, kind: input, shape index: {}]   ;;  %s1668_s4 = inlined_call_operand.vmem [shape: bf16[4,32,8], index: 4, kind: input, shape index: {}]   ;;  %s1669_s5 = inlined_call_operand.vmem [shape: bf16[4,8,32], index: 5, kind: input, shape index: {}]   ;;  %s1670_s6 = inlined_call_operand.vmem [shape: f32[1,32], index: 6, kind: input, shape index: {}]   ;;  %s1671_s7 = inlined_call_operand.hbm [shape: f32[2,8,32], index: 7, kind: output, shape index: {0}]   ;;  %s1672_s8 = inlined_call_operand.hbm [shape: f32[2,4,8,8], index: 8, kind: output, shape index: {1}]  }
   0x1   :  { %1685 = sst [smem:[#allocation22_spill]] %s1672_s8 }
   0x2   :  { %14 = vsyncpa [#allocation6], 0 }
   0x3   :  { %16 = vsyncpa [#allocation6 + $0x1], 0 }
   0x4   :  { %17 = vsyncpa [#allocation8], 0 }
   0x5   :  { %19 = vsyncpa [#allocation8 + $0x1], 0  ;;  %s1373_s27 = smov 0   ;;  %s1375_s28 = smov 0  }
   0x6   :  { %s1377_s29 = smov 0   ;;  %s1379_s30 = smov 0  }
   0x7   :  { %s1381_s9 = smov 0   ;;  %s1383_s10 = smov 0  }
   0x8   :  { %s1385_s11 = smov 0   ;;  %s1387_s12 = smov 0  }
   0x9   :  { %s1389_s13 = smov 0   ;;  %s1391_s14 = smov 0  }
   0xa   :  { %s1393_s15 = smov 0  }
   0xb LB: > { %1686 = sst [smem:[#allocation11_spill]] %s1281_s27  ;;  %s956_s16 = sadd.s32 4294967295, %s1321_s15   ;;  %s1321_s15 = sphi %s1393_s15, %s25_s15   ;;  %s1317_s14 = sphi %s1391_s14, %s1719_s14   ;;  %s1313_s13 = sphi %s1389_s13, %s1718_s13   ;;  %s1309_s12 = sphi %s1387_s12, %s1717_s12   ;;  %s1305_s11 = sphi %s1385_s11, %s1716_s11   ;;  %s1301_s10 = sphi %s1383_s10, %s1715_s10   ;;  %s1297_s9 = sphi %s1381_s9, %s1723_s9   ;;  %s1293_s30 = sphi %s1379_s30, %s1722_s30   ;;  %s1289_s29 = sphi %s1377_s29, %s1713_s29   ;;  %s1285_s28 = sphi %s1375_s28, %s1721_s28   ;;  %s1281_s27 = sphi %s1373_s27, %s1720_s27  }
   0xc   : > { %1687 = sst [smem:[#allocation12_spill]] %s1289_s29  ;;  %s957_s17 = sadd.s32 4294967294, %s1321_s15  }
   0xd   : > { %1688 = sst [smem:[#allocation13_spill]] %s1293_s30  ;;  %s37_s18 = sadd.s32 1, %s1313_s13 }
   0xe   : > { %1689 = sst [smem:[#allocation14_spill]] %s1301_s10  ;;  %s44_s19 = sadd.s32 1, %s1317_s14 }
   0xf   : > { %1690 = sst [smem:[#allocation15_spill]] %s1313_s13  ;;  %p38_p0 = scmp.ge.s32.totalorder %s37_s18, 4 }
  0x10   : > { %1691 = sst [smem:[#allocation16_spill]] %s1317_s14  ;;  %s214_s20 = sadd.s32 1, %s1301_s10 }
  0x11   : > { %p224_p1 = scmp.ne.s32.totalorder %s1301_s10, %s1297_s9  ;;  %p1435_p2 = scmp.eq.s32.totalorder %s956_s16, 7 }
  0x12   : > { %s1725_s18 = smov (%p38_p0, %s37_s18), 0  ;;  %s1727_s19 = smov (!%p38_p0, %s44_s19), %s1317_s14 }
  0x13   : > { %1693 = sst [smem:[#allocation17_spill]] %s1725_s18  ;;  %p1444_p3 = por %p1435_p2, %p224_p1 }
  0x14   : > { %p230_p4 = scmp.ne.s32.totalorder %s1297_s9, %s1293_s30  ;;  %p46_p5 = scmp.ge.s32.totalorder %s1727_s19, 2 }
  0x15   : > { %p1450_p6 = scmp.eq.s32.totalorder %s957_s17, 7  ;;  %s238_s24 = ssub.s32 %s1313_s13, %s1725_s18 }
  0x16   : > { %s244_s25 = sadd.s32 1, %s1289_s29  ;;  %s1729_s19 = smov (%p46_p5, %s1727_s19), 0 }
  0x17   : > { %1696 = sst [smem:[#allocation18_spill]] %s1729_s19  ;;  %p1461_p7 = por %p1450_p6, %p230_p4 }
  0x18   : > { %p254_p8 = scmp.ne.s32.totalorder %s1289_s29, %s1285_s28  ;;  %s209_s16 = ssub.s32 %s1317_s14, %s1729_s19 }
  0x19   : > { %p260_p9 = scmp.ne.s32.totalorder %s1285_s28, %s1281_s27  ;;  %p212_p10 = scmp.eq.s32.totalorder %s209_s16, 0 }
  0x1a   : > { %s239_s17 = sor.u32 %s238_s24, %s209_s16  ;;  %p1473_p12 = por %p254_p8, %p1435_p2 }
  0x1b   : > { %p242_p11 = scmp.eq.s32.totalorder %s239_s17, 0  ;;  %p1485_p13 = por %p260_p9, %p1450_p6 }
  0x1c   : > { %s1478_s18 = scalar_select %p212_p10, %s1301_s10, %s214_s20  }
  0x1d   : > { %s1481_s13 = scalar_select %p242_p11, %s1289_s29, %s244_s25  }
  0x1e   : > { %1699 = sst [smem:[#allocation19_spill]] %s1478_s18  ;;  %p960_p0 = scmp.ge.s32.totalorder %s1321_s15, 1 }
  0x1f   : > { %1700 = sst [smem:[#allocation20_spill]] %s1481_s13  ;;  %p315_p1 = scmp.lt.s32.totalorder %s1321_s15, 9 }
  0x20   : > { %s1701_s8 = scalar_select %p1485_p13, 1, 0 }
  0x21   : > { %p316_p4 = pnand %p960_p0, %p315_p1 }
  0x22   : > { %1702 = sst [smem:[#allocation21_spill]] %s1701_s8  ;;  %s1681_s20 = sand.u32 (!%p316_p4), 1, %s1297_s9  }
  0x23   : > { %319 = sbr.rel (%p316_p4) target bundleno = 1313 (0x521), region = 48  ;;  %s1683_s21 = sand.u32 (!%p316_p4), 1, %s1285_s28  }
  0x24   : > { %s1495_s23 = sshll.u32 (!%p316_p4), %s1681_s20, 3  ;;  %s1499_s24 = sshll.u32 (!%p316_p4), %s1683_s21, 3 }
  0x25   : > { %p364_p2 = scmp.lt.s32.totalorder (!%p316_p4), %s1309_s12, 1  ;;  %p370_p5 = scmp.lt.s32.totalorder (!%p316_p4), %s1305_s11, 3 }
  0x26   : > { %s363_s27 = scalar_lea.vmem (!%p316_p4), [#allocation7], %s1499_s24  ;;  %p966_p6 = scmp.ne.s32.totalorder (!%p316_p4), %s1305_s11, 0 }
  0x2a   : > { %s365_s25 = scalar_select %p364_p2, %s1309_s12, 1 }
  0x2b   : > { %s371_s16 = scalar_select %p370_p5, %s1305_s11, 3 }
  0x2c   : > { %s963_s17 = sshll.u32 %s365_s25, 2  ;;  %383 = sbr.rel (%p966_p6) target bundleno = 51 (0x33), region = 52  ;;  %vm384_vm0 = vcmask (!%p966_p6), 261120   ;;  %v1323_v0 = vmov (!%p966_p6), 0.0  }
  0x2d   : > { %s1508_s18 = scalar_lea.vmem %s1664_s0, %s963_s17  ;;  %s376_s10 = sadd.s32 %s963_s17, %s371_s16  ;;  %385 = vst.msk [vmem:[#allocation4] sm:$0xff] (!%p966_p6), %vm384_vm0, %v1323_v0 }
  0x2e   : > { %s965_s13 = sshll.u32 %s376_s10, 3 }
  0x2f   : > { %s1513_s8 = scalar_lea.vmem %s1665_s1, %s965_s13 }
  0x33 PF: > { %s998_s14 = sshll.u32 %s1305_s11, 4  ;;  %v1324_v1 = vmov 0.0   ;;  %vm1325_vm1 = vmmov 0   ;;  %v390_v5 = vld [vmem:[%s1508_s18] sm:$0xf]  ;;  %vm410_vm2 = vcmask 261120  }
  0x34   : > { %1016 = vmatprep.subr.bf16.mxu0 %v1324_v1  ;;  %s393_s29 = scalar_lea.vmem %s1667_s3, %s998_s14  ;;  %1020 = vmatprep.mubr.msk.bf16.mxu0 %vm1325_vm1, %v1324_v1  ;;  %s529_s25 = scalar_lea.vmem %s1666_s2, %s998_s14  ;;  %v526_v8 = vld [vmem:[%s1508_s18] sm:$0xf]  ;;  %vm457_vm3 = vcmask 60416   ;;  %vm595_vm4 = vcmask 64512   ;;  %vm661_vm5 = vcmask 1043456  }
  0x35   : > { %v1161_v2 = vld [vmem:[%s393_s29] sm:$0xff]   ;;  %1024 = vmatprep.subr.bf16.mxu1 %v1324_v1  ;;  %1028 = vmatprep.mubr.msk.bf16.mxu1 %vm1325_vm1, %v1324_v1  ;;  %s460_s21 = scalar_lea.vmem %s1668_s4, %s998_s14  ;;  %v1162_v3 = vld [vmem:[%s393_s29 + $0x8] sm:$0xff]   ;;  %s1539_s14 = sshll.u32 %s1305_s11, 2 }
  0x36   : > { %1017 = vmatpush3.bf16.msra.mxu0 %v1161_v2  ;;  %v1165_v4 = vld [vmem:[%s460_s21] sm:$0xff]   ;;  %v1164_v7 = vld [vmem:[%s529_s25 + $0x8] sm:$0xff]   ;;  %s456_s18 = scalar_lea.vmem [#allocation2], %s1539_s14  ;;  %s708_s19 = scalar_lea.vmem %s1669_s5, %s1539_s14 }
  0x37   : > { %1018 = vmatprep.subr.bf16.mxu0 %v1324_v1  ;;  %v1163_v6 = vld [vmem:[%s529_s25] sm:$0xff]   ;;  %1025 = vmatpush3.bf16.msra.mxu1 %v1165_v4  ;;  %v1166_v9 = vld [vmem:[%s460_s21 + $0x8] sm:$0xff]   ;;  %s519_s21 = scalar_lea.vmem [#allocation3], %s1539_s14  ;;  %p989_p8 = scmp.ne.s32.totalorder %s1305_s11, 3 }
  0x38   : > { %1026 = vmatprep.subr.bf16.mxu1 %v1324_v1  ;;  %v594_v29 = vld [vmem:[%s1513_s8] sm:$0xff]  ;;  %s1703_s20 = scalar_lea.vmem (!%p989_p8), [#allocation5], %s1495_s23 }
  0x39   : > { %v709_v41 = vld [vmem:[%s708_s19] sm:$0xf] }
  0x3a   : > { %1019 = vmatpush3.bf16.msra.mxu0 %v1162_v3  ;;  %v714_v42 = vsel %vm661_vm5, %v709_v41, 0  ;;  %v705_v52 = vld [vmem:[#allocation4] sm:$0xff] }
  0x3b   : > { %1032 = vmatprep.subr.bf16.mxu0 %v1324_v1  ;;  %1027 = vmatpush3.bf16.msra.mxu1 %v1166_v9  ;;  %v990_v59 = vld [vmem:[%s1670_s6] ss:$0 sm:$0xff] (!%p989_p8) }
  0x3c   : > { %1040 = vmatprep.subr.bf16.mxu1 %v1324_v1 }
  0x3d   : > { %1021 = vmatmul.mubr.msk.bf16.vlgmr.msra.gmra.mrb[0].mxu0 %vm410_vm2, %v390_v5 }
  0x3e   : > { %1033 = vmatpush3.bf16.msra.mxu0 %v1163_v6  ;;  %1036 = vmatprep.mubr.msk.bf16.mxu0 %vm1325_vm1, %v1324_v1 }
  0x3f   : > { %1034 = vmatprep.subr.bf16.mxu0 %v1324_v1  ;;  %1029 = vmatmul.mubr.msk.bf16.vlgmr.msra.gmra.mrb[0].mxu1 %vm410_vm2, %v390_v5 }
  0x40   : > { %1042 = vmatprep.mubr.msk.bf16.mxu1 %vm1325_vm1, %v1324_v1 }
  0x42   : > { %1035 = vmatpush3.bf16.msra.mxu0 %v1164_v7 }
  0x43   : > { %1046 = vmatprep.subr.bf16.mxu0 %v1324_v1 }
  0x45   : > { %1037 = vmatmul.mubr.msk.bf16.vlgmr.msra.gmra.mrb[4].mxu0 %vm410_vm2, %v526_v8 }
  0x46   : > { %1048 = vmatprep.mubr.msk.bf16.mxu0 %vm1325_vm1, %v1324_v1 }
 0x110   : > { %v448_v10 = vpop.f32.mrb[0].mxu0 }
 0x111   : > { %v454_v11 = vpack.c.bf16 %v448_v10, %v448_v10  ;;  %v1022_v12 = vpop.f32.mrb[1].mxu0 }
 0x112   : > { %v451_v13 = vpop.f32.mrb[2].mxu0  ;;  %v511_v22 = vpop.f32.mrb[0].mxu1 }
 0x113   : > { %458 = vst.msk [vmem:[%s456_s18] sm:$0xf] %vm457_vm3, %v454_v11  ;;  %v1023_v14 = vpop.f32.mrb[3].mxu0  ;;  %v517_v23 = vpack.c.bf16 %v511_v22, %v511_v22  ;;  %v1030_v24 = vpop.f32.mrb[1].mxu1 }
 0x114   : > { %v514_v25 = vpop.f32.mrb[2].mxu1 }
 0x115   : > { %520 = vst.msk [vmem:[%s519_s21] sm:$0xf] %vm457_vm3, %v517_v23  ;;  %v1031_v26 = vpop.f32.mrb[3].mxu1 }
 0x118   : > { %v584_v15 = vpop.f32.mrb[4].mxu0 }
 0x119   : > { %v1038_v16 = vpop.f32.mrb[5].mxu0  ;;  %v590_v21 = vpack.c.bf16 %v584_v15, %v584_v15 }
 0x11a   : > { %v593_v17 = vld [vmem:[%s456_s18] sm:$0xf]  ;;  %v587_v18 = vpop.f32.mrb[6].mxu0 }
 0x11b   : > { %v600_v19 = vsel %vm595_vm4, %v593_v17, 0  ;;  %v1039_v20 = vpop.f32.mrb[7].mxu0 }
 0x11c   : > { %1041 = vmatpush3.bf16.xpose.msra.mxu1 %v600_v19  ;;  %v657_v27 = vld [vmem:[%s519_s21] sm:$0xf] }
 0x11d   : > { %1052 = vmatprep.subr.bf16.mxu1 %v1324_v1  ;;  %v663_v28 = vsel %vm661_vm5, %v657_v27, 0 }
 0x11e   : > { %1047 = vmatpush3.bf16.msra.mxu0 %v663_v28 }
 0x123   : > { %1043 = vmatmul.mubr.msk.bf16.vlgmr.msra.gmra.mrb[4].mxu1 %vm595_vm4, %v590_v21 }
 0x124   : > { %1054 = vmatprep.mubr.msk.bf16.mxu1 %vm1325_vm1, %v1324_v1  ;;  %1053 = vmatpush3.bf16.msra.mxu1 %v714_v42 }
 0x1f6   : > { %v636_v30 = vpop.f32.mrb[4].mxu1 }
 0x1f7   : > { %v637_v31 = vadd.f32 %v636_v30, %v594_v29  ;;  %v1044_v32 = vpop.f32.mrb[5].mxu1 }
 0x1f8   : > { %v639_v33 = vpop.f32.mrb[6].mxu1 }
 0x1f9   : > { %642 = vst.msk [vmem:[%s363_s27] sm:$0xff] %vm595_vm4, %v637_v31  ;;  %v1045_v34 = vpop.f32.mrb[7].mxu1  ;;  %v643_v35 = vsel %vm595_vm4, %v637_v31, -inf }
 0x1fa   : > { %644 = vmax.xlane.f32.xlu0 %v643_v35 }
 0x287   : > { %v645_v36 = vpop.xlane.xlu0 %644 }
 0x288   : > { %v646_v37 = vsub.f32 %v637_v31, %v645_v36 }
 0x28a   : > { %v647_v38 = vmul.f32 1.442695, %v646_v37 }
 0x28c   : > { %1167 = vpow2.f32 %v647_v38 }
 0x296   : > { %v1168_v39 = vpop.eup %1167 }
 0x297   : > { %v649_v40 = vsel %vm595_vm4, %v1168_v39, 0.0 }
 0x298   : > { %650 = vadd.xlane.f32.xlu0 %v649_v40 }
 0x325   : > { %v651_v43 = vpop.xlane.xlu0 %650 }
 0x326   : > { %1169 = vrcp.f32 %v651_v43 }
 0x330   : > { %v1170_v44 = vpop.eup %1169 }
 0x331   : > { %v653_v45 = vmul.f32 %v1170_v44, %v1168_v39 }
 0x333   : > { %v654_v46 = vpack.c.bf16 %v653_v45, %v653_v45 }
 0x335   : > { %1049 = vmatmul.mubr.msk.bf16.vlgmr.msra.gmra.mrb[8].mxu0 %vm595_vm4, %v654_v46 }
 0x408   : > { %v699_v47 = vpop.f32.mrb[8].mxu0 }
 0x409   : > { %v706_v48 = vpack.c.bf16 %v699_v47, %v699_v47  ;;  %v1050_v49 = vpop.f32.mrb[9].mxu0 }
 0x40a   : > { %v702_v50 = vpop.f32.mrb[10].mxu0 }
 0x40b   : > { %v1051_v51 = vpop.f32.mrb[11].mxu0  ;;  %1055 = vmatmul.mubr.msk.bf16.vlgmr.msra.gmra.mrb[8].mxu1 %vm595_vm4, %v706_v48 }
 0x4db   : > { %761 = sbr.rel (%p989_p8) target bundleno = 1260 (0x4ec), region = 60 }
 0x4de   : > { %v750_v53 = vpop.f32.mrb[8].mxu1 }
 0x4df   : > { %v756_v54 = vadd.f32 %v750_v53, %v705_v52  ;;  %v1056_v55 = vpop.f32.mrb[9].mxu1 }
 0x4e0   : > { %v753_v56 = vpop.f32.mrb[10].mxu1 }
 0x4e1   : > { %757 = vst.msk [vmem:[#allocation4] sm:$0xff] %vm410_vm2, %v756_v54  ;;  %v1057_v57 = vpop.f32.mrb[11].mxu1 }
 0x4e8   : > { %v762_v58 = vld [vmem:[#allocation4] sm:$0xff] }
 0x4e9   : > { %v770_v60 = vadd.f32 %v990_v59, %v762_v58 }
 0x4eb   : > { %771 = vst.msk [vmem:[%s1703_s20] sm:$0xff] %vm410_vm2, %v770_v60 }
 0x4ec PF: > { %s993_s25 = sshll.u32 %s1309_s12, 7  ;;  %s1704_s18 = scalar_lea.vmem [#allocation5], %s1495_s23 }
 0x4ed   : > { %s1574_s14 = scalar_lea.hbm %s1671_s7, %s993_s25  ;;  %s792_s21 = sshll.u32 %s1704_s18, 4  ;;  %s793_s21 = int_to_ptr.vmem [resolvable:$true] %s792_s21 }
 0x4ee   : > { %s1705_s8 = sand.u32 1, %s1297_s9   ;;  %s1171_s19 = scalar_lea.vmem %s793_s21, 128 }
 0x4ef   : > { %s773_s10 = scalar_lea.sflag [#allocation6], %s1705_s8  ;;  %p1172_p9 = scmp.ne.s32.totalorder %s793_s21, %s1171_s19 }
 0x4f0   : > { %s1326_s29 = smov [#allocation5]  }
 0x4f1   : > { %p1173_p10 = pnand %p1172_p9, %p1444_p3  ;;  %s1175_s13 = sshll.u32 %s1326_s29, 4  ;;  %s1176_s13 = int_to_ptr.vmem [resolvable:$false] %s1175_s13 }
 0x4f2   : > { %s1177_s20 = scalar_lea.vmem %s1176_s13, 256  ;;  %p1178_p0 = scmp.lt.s32.totalorder %s793_s21, %s1176_s13 }
 0x4f3   : > { %p1174_p11 = pneg %p1173_p10  ;;  %p1179_p1 = scmp.lt.s32.totalorder %s1177_s20, %s1171_s19 }
 0x4f5   : > { %p1180_p4 = por %p1179_p1, %p1178_p0 }
 0x4f7   : > { %p1181_p2 = pnand %p1180_p4, %p1174_p11 }
 0x4f9   : > { %1184 = shalt.err (!%p1181_p2)
}
 0x4fa   : > { %s1185_s23 = scalar_lea.hbm %s1574_s14, 128  ;;  %s1189_s17 = scalar_lea.hbm %s1671_s7, 256 }
 0x4fb   : > { %p1186_p5 = scmp.ne.s32.totalorder %s1574_s14, %s1185_s23  ;;  %p1190_p9 = scmp.lt.u32.totalorder %s1574_s14, %s1671_s7 }
 0x4fc   : > { %p1191_p10 = scmp.lt.u32.totalorder %s1189_s17, %s1185_s23  ;;  %p1193_p0 = scmp.lt.u32.totalorder %s1185_s23, %s1574_s14 }
 0x4fd   : > { %p1187_p6 = pnand %p1186_p5, %p1444_p3 }
 0x4fe   : > { %p1192_p11 = por %p1191_p10, %p1190_p9 }
 0x4ff   : > { %p1188_p8 = pneg %p1187_p6 }
 0x500   : > { %p1194_p1 = por %p1193_p0, %p1192_p11 }
 0x502   : > { %p1195_p4 = pnand %p1194_p1, %p1188_p8 }
 0x504   : > { %1198 = shalt.err (!%p1195_p4)
}
 0x505   : > { %1058 = dma.vmem_to_hbm [thread:$0]  (%p1444_p3), %s793_s21, 128, %s1574_s14, %s773_s10  }
 0x506   : > { %s994_s19 = sshll.u32 %s1309_s12, 2  ;;  %s808_s29 = sshll.u32 %s363_s27, 4  ;;  %s1601_s29 = int_to_ptr.vmem [resolvable:$true] %s808_s29 }
 0x507   : > { %s804_s13 = sadd.s32 %s1305_s11, %s994_s19  ;;  %s1706_s22 = sld [smem:[#allocation22_spill]] }
 0x508   : > { %s995_s20 = sshll.u32 %s804_s13, 7  ;;  %s1707_s17 = sand.u32 1, %s1285_s28  }
 0x509   : > { %s778_s18 = scalar_lea.sflag [#allocation8], %s1707_s17  ;;  %s1199_s8 = scalar_lea.vmem %s1601_s29, 128 }
 0x50a   : > { %p1200_p2 = scmp.ne.s32.totalorder %s1601_s29, %s1199_s8  ;;  %s1327_s12 = smov [#allocation7]  }
 0x50b   : > { %s1203_s27 = sshll.u32 %s1327_s12, 4  ;;  %s1204_s27 = int_to_ptr.vmem [resolvable:$false] %s1203_s27 }
 0x50c   : > { %p1201_p3 = pnand %p1200_p2, %p1473_p12  ;;  %s1205_s11 = scalar_lea.vmem %s1204_s27, 256 }
 0x50d   : > { %s806_s16 = scalar_lea.hbm %s1706_s22, %s995_s20  ;;  %p1206_p6 = scmp.lt.s32.totalorder %s1601_s29, %s1204_s27 }
 0x50e   : > { %p1202_p5 = pneg %p1201_p3  ;;  %p1207_p8 = scmp.lt.s32.totalorder %s1205_s11, %s1199_s8 }
 0x510   : > { %p1208_p9 = por %p1207_p8, %p1206_p6 }
 0x512   : > { %p1209_p10 = pnand %p1208_p9, %p1202_p5 }
 0x514   : > { %1212 = shalt.err (!%p1209_p10)
}
 0x515   : > { %s1213_s24 = scalar_lea.hbm %s806_s16, 128  ;;  %s1217_s10 = scalar_lea.hbm %s1706_s22, 1024 }
 0x516   : > { %p1214_p11 = scmp.ne.s32.totalorder %s806_s16, %s1213_s24  ;;  %p1218_p4 = scmp.lt.u32.totalorder %s806_s16, %s1706_s22 }
 0x517   : > { %p1219_p2 = scmp.lt.u32.totalorder %s1217_s10, %s1213_s24  ;;  %p1221_p13 = scmp.lt.u32.totalorder %s1213_s24, %s806_s16 }
 0x518   : > { %p1215_p0 = pnand %p1214_p11, %p1473_p12 }
 0x519   : > { %p1220_p3 = por %p1219_p2, %p1218_p4 }
 0x51a   : > { %p1216_p1 = pneg %p1215_p0 }
 0x51b   : > { %p1222_p6 = por %p1221_p13, %p1220_p3 }
 0x51d   : > { %p1223_p5 = pnand %p1222_p6, %p1216_p1 }
 0x51f   : > { %1226 = shalt.err (!%p1223_p5)
}
 0x520   : > { %1059 = dma.vmem_to_hbm [thread:$0]  (%p1473_p12), %s1601_s29, 128, %s806_s16, %s778_s18  }
 0x521 PF: > { %s1708_s20 = sld [smem:[#allocation13_spill]]  ;;  %p1069_p8 = scmp.ge.s32.totalorder %s1321_s15, 2 }
 0x523   : > { %p1063_p9 = pnand %p1069_p8, %p1461_p7 }
 0x527   : > { %s820_s23 = sand.u32 1, %s1708_s20  }
 0x528   : > { %s821_s25 = scalar_lea.sflag [#allocation6], %s820_s23 }
 0x529   : > { %1272 = dma.done.wait (!%p1063_p9), %s821_s25, 128  }
 0x52a   : > { %1274 = vsyncadd (!%p1063_p9), %s821_s25, 4294967168  ;;  %s1709_s17 = sld [smem:[#allocation11_spill]]  ;;  %s1710_s8 = sld [smem:[#allocation21_spill]] }
 0x530   : > { %s829_s12 = sand.u32 1, %s1709_s17   ;;  %p1711_p13 = scmp.ne.s32.totalorder %s1710_s8, 0 }
 0x531   : > { %s830_s27 = scalar_lea.sflag [#allocation8], %s829_s12 }
 0x532   : > { %p1066_p10 = pnand %p1069_p8, %p1711_p13 }
 0x534   : > { %1276 = dma.done.wait (!%p1066_p10), %s830_s27, 128  }
 0x535   : > { %1278 = vsyncadd (!%p1066_p10), %s830_s27, 4294967168  ;;  %s25_s15 = sadd.s32 1, %s1321_s15   ;;  %s1712_s30 = sld [smem:[#allocation12_spill]] }
 0x536   : > { %p22_p12 = scmp.ge.s32.totalorder %s25_s15, 10   ;;  %s1713_s29 = sld [smem:[#allocation20_spill]] }
 0x537   : > { %s1714_s26 = sld [smem:[#allocation14_spill]]  ;;  %s1715_s10 = sld [smem:[#allocation19_spill]] }
 0x538   : > { %s1716_s11 = sld [smem:[#allocation15_spill]]  ;;  %s1717_s12 = sld [smem:[#allocation16_spill]] }
 0x539   : > { %s1718_s13 = sld [smem:[#allocation17_spill]]  ;;  %s1719_s14 = sld [smem:[#allocation18_spill]] }
 0x53a   : > { %s1720_s27 = smov %s1285_s28  ;;  %24 = sbr.rel (!%p22_p12) target bundleno = 11 (0xb), region = 124 }
 0x53b   : > { %s1721_s28 = smov %s1712_s30  ;;  %s1722_s30 = smov %s1297_s9 }
 0x53d   : > { %s1723_s9 = smov %s1714_s26 }
 0x541   :  { %835 = vsyncpa [#allocation6], 1 }
 0x542   :  { %837 = vsyncpa [#allocation6 + $0x1], 1 }
 0x543   :  { %838 = vsyncpa [#allocation8], 1 }
 0x544   :  { %840 = vsyncpa [#allocation8 + $0x1], 1 }

</bundles_post_ra>
